<compile_context>
chip_gen: v7x
topology: tpu7x:2x2x1
jax: 0.10.0
libtpu: 0.0.40
codegen_flags: <defaults>
</compile_context>

<pallas_src>
import math

import jax
import jax.numpy as jnp
import numpy as np
from jax.experimental import pallas as pl
from jax.experimental.pallas import tpu as pltpu

LOG2 = math.log(2.0)


# --------------------------------------------------------------------------
# Kernel: one (TILE_ROWS, F_padded) tile of x -> same-shape tile of output.
# alpha / beta are single scalars resident in SMEM for the whole grid.
# --------------------------------------------------------------------------
def shifted_softplus_kernel(alpha_ref, beta_ref, x_ref, o_ref):
    alpha = alpha_ref[0]                      # scalar (SMEM)
    beta = beta_ref[0]                        # scalar (SMEM)
    x = x_ref[...]                            # [TILE_ROWS, Fp] f32 (VMEM)

    z = beta * x
    # numerically stable softplus(z) = max(z, 0) + log(1 + exp(-|z|))
    sp = jnp.maximum(z, 0.0) + jnp.log(1.0 + jnp.exp(-jnp.abs(z)))

    # beta == 0 limit: f(x) = 0.5 * alpha * x.  Blend with a 0/1 scalar so no
    # division by zero is ever evaluated (safe_beta) and no predicate
    # broadcast is needed.
    nz = (beta != 0.0).astype(jnp.float32)            # scalar 0.0 / 1.0
    safe_beta = nz * beta + (1.0 - nz)                 # beta, or 1.0 if beta==0
    y_nonzero = (sp - LOG2) / safe_beta
    y_zero = 0.5 * x

    o_ref[...] = alpha * (nz * y_nonzero + (1.0 - nz) * y_zero)


# --------------------------------------------------------------------------
# Wrapper: pads to lane/sublane-dense tiles, tiles the row axis with a grid.
# --------------------------------------------------------------------------
def shifted_softplus(x, alpha, beta, *, block_rows=256):
    x = jnp.asarray(x, jnp.float32)
    orig_shape = x.shape
    x2 = x.reshape(1, -1) if x.ndim == 1 else x.reshape(-1, orig_shape[-1])
    B, F = x2.shape

    # Lane-dense feature dim (multiple of 128) and 8-aligned row tile.
    Fp = max(128, ((F + 127) // 128) * 128)
    tile_rows = min(block_rows, ((B + 7) // 8) * 8)
    tile_rows = ((tile_rows + 7) // 8) * 8
    Bp = ((B + tile_rows - 1) // tile_rows) * tile_rows
    xp = jnp.pad(x2, ((0, Bp - B), (0, Fp - F)))

    alpha_arr = jnp.asarray(alpha, jnp.float32).reshape((1,))
    beta_arr = jnp.asarray(beta, jnp.float32).reshape((1,))

    grid = (Bp // tile_rows,)
    tile_bytes = tile_rows * Fp * 4
    # in + out, double-buffered, plus slack; tiny vs. any generation's VMEM.
    vmem_budget = int(max(4 * tile_bytes + (1 << 20), 4 << 20))

    out = pl.pallas_call(
        shifted_softplus_kernel,
        out_shape=jax.ShapeDtypeStruct((Bp, Fp), jnp.float32),
        grid_spec=pltpu.PrefetchScalarGridSpec(
            num_scalar_prefetch=0,
            grid=grid,
            in_specs=[
                pl.BlockSpec(memory_space=pltpu.MemorySpace.SMEM),   # alpha
                pl.BlockSpec(memory_space=pltpu.MemorySpace.SMEM),   # beta
                pl.BlockSpec((tile_rows, Fp), lambda i: (i, 0)),     # x tile
            ],
            out_specs=pl.BlockSpec((tile_rows, Fp), lambda i: (i, 0)),
        ),
        compiler_params=pltpu.CompilerParams(
            dimension_semantics=("parallel",),
            vmem_limit_bytes=vmem_budget,
        ),
    )(alpha_arr, beta_arr, xp)

    return out[:B, :F].reshape(orig_shape)


# --------------------------------------------------------------------------
# Pure-JAX reference (matches the PyTorch forward exactly)
# --------------------------------------------------------------------------
def shifted_softplus_reference(x, alpha, beta):
    x = jnp.asarray(x, jnp.float32)
    beta = jnp.asarray(beta, jnp.float32)
    alpha = jnp.asarray(alpha, jnp.float32)
    z = beta * x
    sp = jnp.logaddexp(z, 0.0)                         # softplus
    safe_beta = jnp.where(beta != 0.0, beta, 1.0)
    return alpha * jnp.where(beta != 0.0, (sp - LOG2) / safe_beta, 0.5 * x)


if __name__ == "__main__":
    key = jax.random.PRNGKey(0)
    k1, k2 = jax.random.split(key)

    # (num_samples, num_features) — lane-dense demo shape
    B, F = 512, 128
    x = 4.0 * jax.random.normal(k1, (B, F), jnp.float32)

    # Module defaults: alpha = 1.0, beta = 1.0
    y = jax.block_until_ready(shifted_softplus(x, 1.0, 1.0))
    y_ref = shifted_softplus_reference(x, 1.0, 1.0)
    np.testing.assert_allclose(np.asarray(y), np.asarray(y_ref),
                               rtol=1e-5, atol=1e-5)

    # beta -> 0 limit must give 0.5 * alpha * x (here alpha = 2 => identity)
    y0 = jax.block_until_ready(shifted_softplus(x, 2.0, 0.0))
    np.testing.assert_allclose(np.asarray(y0), np.asarray(x),
                               rtol=1e-6, atol=1e-6)

    # non-aligned shape exercises the padding path
    x_odd = jax.random.normal(k2, (37, 70), jnp.float32)
    y_odd = jax.block_until_ready(shifted_softplus(x_odd, 1.3, 0.7))
    np.testing.assert_allclose(np.asarray(y_odd),
                               np.asarray(shifted_softplus_reference(x_odd, 1.3, 0.7)),
                               rtol=1e-5, atol=1e-5)

    print("KERNEL_OK")
</pallas_src>

<mosaic_0001>
module attributes {stable_mosaic.version = 11 : i64} {
  func.func @shifted_softplus_kernel(%arg0: i32, %arg1: memref<1xf32, #tpu.memory_space<smem>>, %arg2: memref<1xf32, #tpu.memory_space<smem>>, %arg3: memref<256x128xf32, #tpu.memory_space<vmem>>, %arg4: memref<256x128xf32, #tpu.memory_space<vmem>>) attributes {dimension_semantics = [#tpu.dimension_semantics<parallel>], iteration_bounds = array<i64: 2>, scalar_prefetch = 0 : i64, scratch_operands = 0 : i64, tpu.core_type = #tpu.core_type<tc>, window_params = [{transform_indices = @transform_0, window_bounds = array<i64: 1>}, {transform_indices = @transform_1, window_bounds = array<i64: 1>}, {transform_indices = @transform_2, window_bounds = array<i64: 256, 128>}, {transform_indices = @transform_3, window_bounds = array<i64: 256, 128>}]} {
    %c0 = arith.constant 0 : index
    %0 = memref.load %arg1[%c0] : memref<1xf32, #tpu.memory_space<smem>>
    %c0_0 = arith.constant 0 : index
    %1 = memref.load %arg2[%c0_0] : memref<1xf32, #tpu.memory_space<smem>>
    %c0_1 = arith.constant 0 : index
    %c0_2 = arith.constant 0 : index
    %2 = vector.load %arg3[%c0_1, %c0_2] : memref<256x128xf32, #tpu.memory_space<vmem>>, vector<256x128xf32>
    %3 = vector.broadcast %1 : f32 to vector<256x128xf32>
    %4 = arith.mulf %3, %2 : vector<256x128xf32>
    %cst = arith.constant 0.000000e+00 : f32
    %5 = vector.broadcast %cst : f32 to vector<256x128xf32>
    %6 = arith.maximumf %4, %5 : vector<256x128xf32>
    %7 = math.absf %4 : vector<256x128xf32>
    %cst_3 = arith.constant 0.000000e+00 : f32
    %8 = vector.broadcast %cst_3 : f32 to vector<256x128xf32>
    %9 = arith.subf %8, %7 : vector<256x128xf32>
    %10 = math.exp %9 : vector<256x128xf32>
    %cst_4 = arith.constant 1.000000e+00 : f32
    %11 = vector.broadcast %cst_4 : f32 to vector<256x128xf32>
    %12 = arith.addf %11, %10 : vector<256x128xf32>
    %13 = math.log %12 : vector<256x128xf32>
    %14 = arith.addf %6, %13 : vector<256x128xf32>
    %cst_5 = arith.constant 0.000000e+00 : f32
    %15 = arith.cmpf one, %1, %cst_5 : f32
    %16 = arith.extui %15 : i1 to i32
    %17 = arith.sitofp %16 : i32 to f32
    %18 = arith.mulf %17, %1 : f32
    %cst_6 = arith.constant 1.000000e+00 : f32
    %19 = arith.subf %cst_6, %17 : f32
    %20 = arith.addf %18, %19 : f32
    %cst_7 = arith.constant 0.693147182 : f32
    %21 = vector.broadcast %cst_7 : f32 to vector<256x128xf32>
    %22 = arith.subf %14, %21 : vector<256x128xf32>
    %23 = vector.broadcast %20 : f32 to vector<256x128xf32>
    %24 = arith.divf %22, %23 : vector<256x128xf32>
    %cst_8 = arith.constant 5.000000e-01 : f32
    %25 = vector.broadcast %cst_8 : f32 to vector<256x128xf32>
    %26 = arith.mulf %25, %2 : vector<256x128xf32>
    %27 = vector.broadcast %17 : f32 to vector<256x128xf32>
    %28 = arith.mulf %27, %24 : vector<256x128xf32>
    %cst_9 = arith.constant 1.000000e+00 : f32
    %29 = arith.subf %cst_9, %17 : f32
    %30 = vector.broadcast %29 : f32 to vector<256x128xf32>
    %31 = arith.mulf %30, %26 : vector<256x128xf32>
    %32 = arith.addf %28, %31 : vector<256x128xf32>
    %33 = vector.broadcast %0 : f32 to vector<256x128xf32>
    %34 = arith.mulf %33, %32 : vector<256x128xf32>
    %c0_10 = arith.constant 0 : index
    %c0_11 = arith.constant 0 : index
    %35 = vector.load %arg4[%c0_10, %c0_11] : memref<256x128xf32, #tpu.memory_space<vmem>>, vector<256x128xf32>
    tpu.vector_store %arg4[%c0_10, %c0_11], %34 {strides = array<i32>} : memref<256x128xf32, #tpu.memory_space<vmem>>, vector<256x128xf32>,
    return
  }
  func.func @transform_0(%arg0: i32) -> i32 {
    %c0_i32 = arith.constant 0 : i32
    %c0_i32_0 = arith.constant 0 : i32
    return %c0_i32 : i32
  }
  func.func @transform_1(%arg0: i32) -> i32 {
    %c0_i32 = arith.constant 0 : i32
    %c0_i32_0 = arith.constant 0 : i32
    return %c0_i32 : i32
  }
  func.func @transform_2(%arg0: i32) -> (i32, i32) {
    %c0_i32 = arith.constant 0 : i32
    %c0_i32_0 = arith.constant 0 : i32
    return %arg0, %c0_i32 : i32, i32
  }
  func.func @transform_3(%arg0: i32) -> (i32, i32) {
    %c0_i32 = arith.constant 0 : i32
    %c0_i32_0 = arith.constant 0 : i32
    return %arg0, %c0_i32 : i32, i32
  }
}

</mosaic_0001>

<bundles_post_ra>
// kernel: tpu_custom_call.1
= control target key start
LH: loop header
LB: loop body
LE: loop exit
PB: predicated region body
PF: predicated region fallthrough
CT: control target
= control target key end

     0   :  { %s2015_s0 = inlined_call_operand.<no memory space> [shape: f32[1], index: 0, kind: input, shape index: {}]   ;;  %s2016_s1 = inlined_call_operand.<no memory space> [shape: f32[1], index: 1, kind: input, shape index: {}]   ;;  %s2017_s2 = inlined_call_operand.hbm [shape: f32[512,128], index: 2, kind: input, shape index: {}]   ;;  %s2018_s3 = inlined_call_operand.hbm [shape: f32[512,128], index: 3, kind: output, shape index: {}]  }
   0x1   :  { %8 = sst [smem:[#allocation2]] %s2015_s0 }
   0x2   :  { %9 = sst [smem:[#allocation3]] %s2016_s1 }
   0x3   :  { %10 = vsyncpa [#allocation5], 0 }
   0x4   :  { %12 = vsyncpa [#allocation5 + $0x1], 0 }
   0x5   :  { %13 = vsyncpa [#allocation6], 0 }
   0x6   :  { %15 = vsyncpa [#allocation6 + $0x1], 0  ;;  %s1260_s16 = smov 0   ;;  %s1262_s17 = smov 0  }
   0x7   :  { %s1264_s18 = smov 0   ;;  %s1266_s19 = smov 0  }
   0x8 LB: > { %s1281_s0 = sadd.s32 4294967295, %s1226_s19   ;;  %s902_s1 = sadd.s32 4294967294, %s1226_s19   ;;  %s1226_s19 = sphi %s1266_s19, %s2032_s19   ;;  %s1222_s18 = sphi %s1264_s18, %s2031_s18   ;;  %s1218_s17 = sphi %s1262_s17, %s2030_s17   ;;  %s1214_s16 = sphi %s1260_s16, %s2029_s16  }
   0x9   : > { %s1285_s20 = sadd.s32 1, %s1226_s19   ;;  %s70_s21 = sadd.s32 1, %s1222_s18 }
   0xa   : > { %s67_s22 = ssub.s32 %s1226_s19, %s1285_s20  ;;  %p77_p0 = scmp.ne.s32.totalorder %s1222_s18, %s1218_s17 }
   0xb   : > { %p68_p1 = scmp.eq.s32.totalorder %s67_s22, 0  ;;  %p78_p2 = scmp.eq.s32.totalorder %s1226_s19, 0 }
   0xc   : > { %p83_p3 = scmp.ne.s32.totalorder %s1218_s17, %s1214_s16  ;;  %p84_p4 = scmp.eq.s32.totalorder %s1281_s0, 0 }
   0xd   : > { %s1297_s23 = scalar_select %p68_p1, %s1222_s18, %s70_s21  }
   0xe   : > { %p1299_p5 = por %p78_p2, %p77_p0  ;;  %p1303_p6 = por %p84_p4, %p83_p3 }
   0xf   : > { %p107_p7 = scmp.eq.s32.totalorder %s1281_s0, 1  ;;  %p113_p8 = scmp.eq.s32.totalorder %s902_s1, 1 }
  0x10   : > { %p962_p10 = scmp.lt.s32.totalorder %s1226_s19, 2  ;;  %s139_s28 = sand.u32 1, %s1222_s18  }
  0x11   : > { %p1310_p11 = por %p107_p7, %p77_p0  ;;  %p1314_p12 = por %p113_p8, %p83_p3 }
  0x12   : > { %s948_s29 = sshll.u32 %s1226_s19, 12  ;;  %s905_s30 = sshll.u32 %s139_s28, 8 }
  0x13   : > { %s2022_s26 = scalar_select %p1310_p11, 1, 0 }
  0x14   : > { %s2023_s27 = scalar_select %p1314_p12, 1, 0 }
  0x15   : > { %s1323_s6 = scalar_lea.hbm %s2017_s2, %s948_s29  ;;  %s143_s7 = scalar_lea.vmem [#allocation4], %s905_s30 }
  0x16   : > { %s150_s8 = sshll.u32 %s143_s7, 4  ;;  %p1327_p13 = pnand %p962_p10, %p1299_p5  ;;  %s1331_s8 = int_to_ptr.vmem [resolvable:$true] %s150_s8 }
  0x17   : > { %s1333_s10 = scalar_lea.sflag [#allocation5], %s139_s28  ;;  %s1130_s11 = scalar_lea.hbm %s1323_s6, 4096 }
  0x18   : > { %p1131_p0 = scmp.ne.s32.totalorder %s1323_s6, %s1130_s11  ;;  %p1132_p1 = pneg %p1327_p13 }
  0x19   : > { %s1135_s14 = scalar_lea.hbm %s2017_s2, 8192  ;;  %p1136_p4 = scmp.lt.u32.totalorder %s1323_s6, %s2017_s2 }
  0x1a   : > { %p1133_p2 = pnand %p1132_p1, %p1131_p0  ;;  %p1137_p5 = scmp.lt.u32.totalorder %s1135_s14, %s1130_s11 }
  0x1b   : > { %p1139_p8 = scmp.lt.u32.totalorder %s1130_s11, %s1323_s6 }
  0x1c   : > { %p1134_p3 = pneg %p1133_p2  ;;  %p1138_p7 = por %p1137_p5, %p1136_p4 }
  0x1e   : > { %p1140_p10 = por %p1139_p8, %p1138_p7 }
  0x20   : > { %p1141_p9 = pnand %p1140_p10, %p1134_p3 }
  0x22   : > { %1144 = shalt.err (!%p1141_p9)
}
  0x23   : > { %s1145_s21 = scalar_lea.vmem %s1331_s8, 4096  ;;  %s1228_s22 = smov [#allocation4]  }
  0x24   : > { %p1146_p0 = scmp.ne.s32.totalorder %s1331_s8, %s1145_s21  ;;  %s1150_s24 = sshll.u32 %s1228_s22, 4  ;;  %s1151_s24 = int_to_ptr.vmem [resolvable:$false] %s1150_s24 }
  0x25   : > { %s1152_s28 = scalar_lea.vmem %s1151_s24, 8192  ;;  %p1153_p11 = scmp.lt.s32.totalorder %s1331_s8, %s1151_s24 }
  0x26   : > { %p1148_p2 = pnand %p1146_p0, %p1132_p1  ;;  %p1154_p4 = scmp.lt.s32.totalorder %s1152_s28, %s1145_s21 }
  0x28   : > { %p1149_p12 = pneg %p1148_p2  ;;  %p1155_p5 = por %p1154_p4, %p1153_p11 }
  0x2a   : > { %p1156_p7 = pnand %p1155_p5, %p1149_p12 }
  0x2c   : > { %1159 = shalt.err (!%p1156_p7)
}
  0x2d   : > { %s1229_s29 = smov 128   ;;  %s1230_s30 = smov 8  }
  0x2e   : > { %957 = dma.hbm_to_vmem [thread:$0]  (!%p1327_p13), %s1323_s6, 4096, %s1331_s8, %s1333_s10, %s1229_s29, %s1229_s29, %s1230_s30  }
  0x2f   : > { %p908_p9 = scmp.ge.s32.totalorder %s1226_s19, 1  ;;  %p158_p1 = scmp.lt.s32.totalorder %s1226_s19, 3 }
  0x31   : > { %p159_p3 = pnand %p908_p9, %p158_p1 }
  0x32   : > { %s1364_s4 = sand.u32 (!%p159_p3), 1, %s1218_s17  }
  0x33   : > { %162 = sbr.rel (%p159_p3) target bundleno = 246 (0xf6), region = 32  ;;  %s909_s5 = sshll.u32 (!%p159_p3), %s1364_s4, 8 }
  0x34   : > { %s165_s7 = scalar_lea.sflag (!%p159_p3), [#allocation5], %s1364_s4  ;;  %s1370_s11 = scalar_lea.vmem (!%p159_p3), [#allocation4], %s909_s5 }
  0x3a   : > { %1205 = dma.done.wait (%p1303_p6), %s165_s7, 4096  }
  0x3b   : > { %1207 = vsyncadd (%p1303_p6), %s165_s7, 4294963200  ;;  %s1376_s6 = sld [smem:[#allocation3]]  ;;  %v195_v0 = vld [vmem:[%s1370_s11] sm:$0xff]  ;;  %v196_v2 = vld [vmem:[%s1370_s11 + $0x8] sm:$0xff]  ;;  %s1591_s14 = scalar_lea.vmem [#allocation7], %s909_s5 }
  0x3c   : > { %s193_s8 = sld [smem:[#allocation2]]  ;;  %v197_v5 = vld [vmem:[%s1370_s11 + $0x10] sm:$0xff]  ;;  %v198_v6 = vld [vmem:[%s1370_s11 + $0x18] sm:$0xff]  ;;  %v199_v9 = vld [vmem:[%s1370_s11 + $0x20] sm:$0xff]  ;;  %v620_v26 = vmul.f32 0.5, %v195_v0  ;;  %v621_v27 = vmul.f32 0.5, %v196_v2 }
  0x3d   : > { %v200_v14 = vld [vmem:[%s1370_s11 + $0x28] sm:$0xff]  ;;  %v1419_v29 = vld [vmem:[%s1370_s11 + $0x30] sm:$0xff]  ;;  %v622_v30 = vmul.f32 0.5, %v197_v5  ;;  %v623_v31 = vmul.f32 0.5, %v198_v6  ;;  %v1422_v33 = vld [vmem:[%s1370_s11 + $0x38] sm:$0xff]  ;;  %v624_v46 = vmul.f32 0.5, %v199_v9 }
  0x3e   : > { %v1442_v44 = vld [vmem:[%s1370_s11 + $0x40] sm:$0xff]  ;;  %v1449_v48 = vld [vmem:[%s1370_s11 + $0x48] sm:$0xff]  ;;  %v625_v51 = vmul.f32 0.5, %v200_v14  ;;  %v1469_v60 = vld [vmem:[%s1370_s11 + $0x50] sm:$0xff]  ;;  %s949_s15 = sshll.u32 %s1281_s0, 12  ;;  %s829_s1 = sshll.u32 %s1591_s14, 4  ;;  %s1970_s1 = int_to_ptr.vmem [resolvable:$true] %s829_s1 }
  0x3f   : > { %s1967_s24 = scalar_lea.hbm %s2018_s3, %s949_s15  ;;  %s816_s28 = scalar_lea.sflag [#allocation6], %s1364_s4 }
  0x40   : > { %s1160_s29 = scalar_lea.vmem %s1970_s1, 4096  ;;  %p2026_p12 = scmp.ne.s32.totalorder %s2022_s26, 0 }
  0x41   : > { %v1380_v1 = vstv %s1376_s6  ;;  %p548_p11 = scmp.ne.f32.partialorder %s1376_s6, 0.0  ;;  %p1161_p6 = scmp.ne.s32.totalorder %s1970_s1, %s1160_s29 }
  0x42   : > { %v1385_v3 = vmul.f32 %v1380_v1, %v195_v0  ;;  %v1388_v4 = vmul.f32 %v1380_v1, %v196_v2  ;;  %v1393_v7 = vmul.f32 %v1380_v1, %v197_v5  ;;  %v1396_v8 = vmul.f32 %v1380_v1, %v198_v6  ;;  %s1231_s0 = smov [#allocation7]  }
  0x43   : > { %s549_s25 = scalar_select %p548_p11, 1, 0  ;;  %v1407_v17 = vmul.f32 %v1380_v1, %v199_v9  ;;  %v1410_v22 = vmul.f32 %v1380_v1, %v200_v14  ;;  %v1415_v23 = vstv %s193_s8  ;;  %v1433_v40 = vmul.f32 %v1380_v1, %v1419_v29 }
  0x44   : > { %v292_v10 = vand.u32 2147483647, %v1385_v3  ;;  %v293_v11 = vand.u32 2147483647, %v1388_v4  ;;  %v294_v12 = vand.u32 2147483647, %v1393_v7  ;;  %v1439_v43 = vmul.f32 %v1380_v1, %v1422_v33  ;;  %p1162_p13 = pnand %p1161_p6, %p2026_p12 }
  0x45   : > { %s1401_s9 = scvt.s32.f32 %s549_s25  ;;  %v295_v13 = vand.u32 2147483647, %v1396_v8  ;;  %v296_v25 = vand.u32 2147483647, %v1407_v17  ;;  %v260_v34 = vmax.f32 %v1385_v3, 0.0  ;;  %v261_v35 = vmax.f32 %v1388_v4, 0.0 }
  0x46   : > { %v324_v15 = vsub.f32 0.0, %v292_v10  ;;  %v325_v16 = vsub.f32 0.0, %v293_v11  ;;  %v326_v18 = vsub.f32 0.0, %v294_v12  ;;  %v262_v36 = vmax.f32 %v1393_v7, 0.0  ;;  %p1163_p8 = pneg %p1162_p13  ;;  %s1164_s30 = sshll.u32 %s1231_s0, 4  ;;  %s1165_s30 = int_to_ptr.vmem [resolvable:$false] %s1164_s30 }
  0x47   : > { %v327_v19 = vsub.f32 0.0, %v295_v13  ;;  %s551_s10 = smul.f32 %s1401_s9, %s1376_s6  ;;  %s552_s12 = ssub.f32 1.0, %s1401_s9  ;;  %v328_v32 = vsub.f32 0.0, %v296_v25  ;;  %v297_v37 = vand.u32 2147483647, %v1410_v22  ;;  %v263_v38 = vmax.f32 %v1396_v8, 0.0 }
  0x48   : > { %v356_v20 = vmul.f32 1.442695, %v324_v15  ;;  %v358_v21 = vmul.f32 1.442695, %v325_v16  ;;  %v360_v24 = vmul.f32 1.442695, %v326_v18  ;;  %v1445_v45 = vstv %s1401_s9  ;;  %p1167_p10 = scmp.lt.s32.totalorder %s1970_s1, %s1165_s30 }
  0x49   : > { %v362_v28 = vmul.f32 1.442695, %v327_v19  ;;  %s1428_s13 = sadd.f32 %s552_s12, %s551_s10  ;;  %v364_v39 = vmul.f32 1.442695, %v328_v32  ;;  %v1435_v41 = vstv %s552_s12  ;;  %v329_v42 = vsub.f32 0.0, %v297_v37  ;;  %v1488_v18 = vld [vmem:[%s1370_s11 + $0x58] sm:$0xff] }
  0x4a   : > { %1000 = vpow2.f32 %v356_v20  ;;  %v298_v47 = vand.u32 2147483647, %v1433_v40  ;;  %v264_v49 = vmax.f32 %v1407_v17, 0.0  ;;  %v299_v52 = vand.u32 2147483647, %v1439_v43  ;;  %v1495_v25 = vld [vmem:[%s1370_s11 + $0x60] sm:$0xff] }
  0x4b   : > { %1002 = vpow2.f32 %v358_v21  ;;  %v366_v50 = vmul.f32 1.442695, %v329_v42  ;;  %v586_v53 = vstv %s1428_s13  ;;  %v1455_v54 = vmul.f32 %v1435_v41, %v620_v26  ;;  %s1166_s5 = scalar_lea.vmem %s1165_s30, 8192 }
  0x4c   : > { %1004 = vpow2.f32 %v360_v24  ;;  %v330_v55 = vsub.f32 0.0, %v298_v47  ;;  %v1459_v56 = vmul.f32 %v1380_v1, %v1442_v44  ;;  %v1462_v57 = vmul.f32 %v1435_v41, %v621_v27  ;;  %p1168_p0 = scmp.lt.s32.totalorder %s1166_s5, %s1160_s29 }
  0x4d   : > { %1006 = vpow2.f32 %v362_v28  ;;  %v331_v58 = vsub.f32 0.0, %v299_v52  ;;  %v1466_v59 = vmul.f32 %v1380_v1, %v1449_v48  ;;  %v1472_v61 = vmul.f32 %v1435_v41, %v622_v30  ;;  %v1510_v52 = vld [vmem:[%s1370_s11 + $0x68] sm:$0xff] }
  0x4e   : > { %1008 = vpow2.f32 %v364_v39  ;;  %v1475_v62 = vmul.f32 %v1435_v41, %v623_v31  ;;  %v368_v63 = vmul.f32 1.442695, %v330_v55  ;;  %v300_v0 = vand.u32 2147483647, %v1459_v56  ;;  %p1169_p2 = por %p1168_p0, %p1167_p10 }
  0x4f   : > { %1010 = vpow2.f32 %v366_v50  ;;  %v1479_v5 = vmul.f32 %v1435_v41, %v624_v46  ;;  %v370_v6 = vmul.f32 1.442695, %v331_v58  ;;  %v301_v9 = vand.u32 2147483647, %v1466_v59 }
  0x50   : > { %1012 = vrcp.f32 %v586_v53  ;;  %v332_v12 = vsub.f32 0.0, %v300_v0  ;;  %v1484_v13 = vmul.f32 %v1380_v1, %v1469_v60  ;;  %v265_v15 = vmax.f32 %v1410_v22, 0.0  ;;  %p1170_p4 = pnand %p1169_p2, %p1163_p8 }
  0x51   : > { %1014 = vpow2.f32 %v368_v63  ;;  %v333_v16 = vsub.f32 0.0, %v301_v9  ;;  %v1491_v20 = vmul.f32 %v1435_v41, %v625_v51  ;;  %v626_v28 = vmul.f32 0.5, %v1419_v29  ;;  %v1518_v63 = vld [vmem:[%s1370_s11 + $0x70] sm:$0xff] }
  0x52   : > { %1016 = vpow2.f32 %v370_v6  ;;  %v372_v21 = vmul.f32 1.442695, %v332_v12  ;;  %v302_v24 = vand.u32 2147483647, %v1484_v13  ;;  %v1500_v39 = vmul.f32 %v1380_v1, %v1488_v18 }
  0x53   : > { %v374_v30 = vmul.f32 1.442695, %v333_v16  ;;  %v627_v46 = vmul.f32 0.5, %v1422_v33  ;;  %v1505_v47 = vmul.f32 %v1380_v1, %v1495_v25  ;;  %v266_v29 = vmax.f32 %v1433_v40, 0.0 }
  0x54   : > { %v1001_v2 = vpop.eup %1000  ;;  %v334_v37 = vsub.f32 0.0, %v302_v24  ;;  %v303_v51 = vand.u32 2147483647, %v1500_v39  ;;  %v1513_v55 = vmul.f32 %v1435_v41, %v626_v28  ;;  %v628_v58 = vmul.f32 0.5, %v1442_v44 }
  0x55   : > { %v1003_v10 = vpop.eup %1002  ;;  %v420_v11 = vadd.f32 1.0, %v1001_v2  ;;  %v304_v33 = vand.u32 2147483647, %v1505_v47  ;;  %v267_v2 = vmax.f32 %v1439_v43, 0.0  ;;  %v1528_v12 = vmul.f32 %v1380_v1, %v1510_v52 }
  0x56   : > { %v421_v14 = vadd.f32 1.0, %v1003_v10  ;;  %v1005_v19 = vpop.eup %1004  ;;  %v376_v50 = vmul.f32 1.442695, %v334_v37  ;;  %v335_v6 = vsub.f32 0.0, %v303_v51  ;;  %v1524_v10 = vmul.f32 %v1435_v41, %v627_v46 }
  0x57   : > { %1018 = vlog2.f32 %v420_v11  ;;  %v1007_v26 = vpop.eup %1006  ;;  %v422_v27 = vadd.f32 1.0, %v1005_v19  ;;  %v336_v11 = vsub.f32 0.0, %v304_v33  ;;  %v1535_v19 = vmul.f32 %v1380_v1, %v1518_v63 }
  0x58   : > { %1020 = vlog2.f32 %v421_v14  ;;  %v1009_v31 = vpop.eup %1008  ;;  %v423_v32 = vadd.f32 1.0, %v1007_v26  ;;  %v1531_v14 = vmul.f32 0.5, %v1449_v48  ;;  %v378_v16 = vmul.f32 1.442695, %v335_v6 }
  0x59   : > { %1022 = vpow2.f32 %v372_v21  ;;  %v424_v42 = vadd.f32 1.0, %v1009_v31  ;;  %v1011_v53 = vpop.eup %1010  ;;  %v268_v26 = vmax.f32 %v1459_v56, 0.0  ;;  %v305_v28 = vand.u32 2147483647, %v1528_v12  ;;  %v1615_v56 = vld [vmem:[%s1370_s11 + $0x80] sm:$0xff] }
  0x5a   : > { %1024 = vlog2.f32 %v422_v27  ;;  %v425_v0 = vadd.f32 1.0, %v1011_v53  ;;  %v1521_v9 = vpop.eup %1012  ;;  %v1539_v27 = vmul.f32 %v1435_v41, %v628_v58  ;;  %v269_v48 = vmax.f32 %v1466_v59, 0.0 }
  0x5b   : > { %1026 = vlog2.f32 %v423_v32  ;;  %v1015_v44 = vpop.eup %1014  ;;  %v380_v32 = vmul.f32 1.442695, %v336_v11  ;;  %v337_v46 = vsub.f32 0.0, %v305_v28  ;;  %v1546_v33 = vmul.f32 0.5, %v1469_v60 }
  0x5c   : > { %1028 = vlog2.f32 %v424_v42  ;;  %v1017_v21 = vpop.eup %1016  ;;  %v426_v24 = vadd.f32 1.0, %v1015_v44 }
  0x5d   : > { %1030 = vpow2.f32 %v374_v30  ;;  %v427_v31 = vadd.f32 1.0, %v1017_v21  ;;  %v382_v21 = vmul.f32 1.442695, %v337_v46 }
  0x5e   : > { %1032 = vpow2.f32 %v376_v50  ;;  %v306_v50 = vand.u32 2147483647, %v1535_v19 }
  0x5f   : > { %1034 = vlog2.f32 %v425_v0  ;;  %v1549_v0 = vld [vmem:[%s1370_s11 + $0x78] sm:$0xff] }
  0x60   : > { %1036 = vpow2.f32 %v378_v16  ;;  %v1554_v16 = vmul.f32 0.5, %v1488_v18  ;;  %v1560_v3 = vmul.f32 %v1380_v1, %v1549_v0 }
  0x61   : > { %v1019_v30 = vpop.eup %1018  ;;  %1038 = vlog2.f32 %v426_v24 }
  0x62   : > { %v1021_v37 = vpop.eup %1020  ;;  %v453_v42 = vmul.f32 0.6931472, %v1019_v30  ;;  %1040 = vlog2.f32 %v427_v31  ;;  %v338_v31 = vsub.f32 0.0, %v306_v50 }
  0x63   : > { %v1023_v51 = vpop.eup %1022  ;;  %v455_v53 = vmul.f32 0.6931472, %v1021_v37  ;;  %1042 = vpow2.f32 %v380_v32 }
  0x64   : > { %v1025_v6 = vpop.eup %1024  ;;  %v516_v11 = vadd.f32 %v453_v42, %v260_v34  ;;  %v428_v44 = vadd.f32 1.0, %v1023_v51  ;;  %v1567_v51 = vmul.f32 1.442695, %v338_v31 }
  0x65   : > { %v1027_v24 = vpop.eup %1026  ;;  %v517_v28 = vadd.f32 %v455_v53, %v261_v35  ;;  %v457_v30 = vmul.f32 0.6931472, %v1025_v6 }
  0x66   : > { %v1029_v60 = vpop.eup %1028  ;;  %v911_v37 = vadd.f32 -0.6931472, %v516_v11  ;;  %v459_v58 = vmul.f32 0.6931472, %v1027_v24  ;;  %1044 = vlog2.f32 %v428_v44 }
  0x67   : > { %v1031_v34 = vpop.eup %1030  ;;  %v912_v42 = vadd.f32 -0.6931472, %v517_v28  ;;  %v518_v18 = vadd.f32 %v457_v30, %v262_v36  ;;  %v461_v46 = vmul.f32 0.6931472, %v1029_v60  ;;  %1046 = vpow2.f32 %v382_v21 }
  0x68   : > { %v1033_v4 = vpop.eup %1032  ;;  %v588_v35 = vmul.f32 %v1521_v9, %v911_v37  ;;  %v519_v32 = vadd.f32 %v459_v58, %v263_v38  ;;  %v429_v50 = vadd.f32 1.0, %v1031_v34 }
  0x69   : > { %v1035_v53 = vpop.eup %1034  ;;  %v589_v6 = vmul.f32 %v1521_v9, %v912_v42  ;;  %v913_v11 = vadd.f32 -0.6931472, %v518_v18  ;;  %v520_v44 = vadd.f32 %v461_v46, %v264_v49  ;;  %v430_v7 = vadd.f32 1.0, %v1033_v4 }
  0x6a   : > { %v653_v36 = vmul.f32 %v1445_v45, %v588_v35  ;;  %v914_v21 = vadd.f32 -0.6931472, %v519_v32  ;;  %v463_v24 = vmul.f32 0.6931472, %v1035_v53  ;;  %1048 = vlog2.f32 %v429_v50  ;;  %v1037_v28 = vpop.eup %1036 }
  0x6b   : > { %v654_v8 = vmul.f32 %v1445_v45, %v589_v6  ;;  %v590_v38 = vmul.f32 %v1521_v9, %v913_v11  ;;  %v915_v58 = vadd.f32 -0.6931472, %v520_v44  ;;  %1050 = vlog2.f32 %v430_v7  ;;  %v1039_v30 = vpop.eup %1038 }
  0x6c   : > { %v718_v31 = vadd.f32 %v1455_v54, %v653_v36  ;;  %v591_v60 = vmul.f32 %v1521_v9, %v914_v21  ;;  %v521_v17 = vadd.f32 %v463_v24, %v265_v15  ;;  %v431_v49 = vadd.f32 1.0, %v1037_v28  ;;  %v1041_v37 = vpop.eup %1040 }
  0x6d   : > { %v719_v34 = vadd.f32 %v1462_v57, %v654_v8  ;;  %v655_v42 = vmul.f32 %v1445_v45, %v590_v38  ;;  %v592_v18 = vmul.f32 %v1521_v9, %v915_v58  ;;  %v465_v46 = vmul.f32 0.6931472, %v1039_v30  ;;  %v1043_v50 = vpop.eup %1042 }
  0x6e   : > { %v751_v4 = vmul.f32 %v1415_v23, %v718_v31  ;;  %v656_v35 = vmul.f32 %v1445_v45, %v591_v60  ;;  %v916_v54 = vadd.f32 -0.6931472, %v521_v17  ;;  %v467_v32 = vmul.f32 0.6931472, %v1041_v37 }
  0x6f   : > { %v752_v22 = vmul.f32 %v1415_v23, %v719_v34  ;;  %v720_v15 = vadd.f32 %v1472_v61, %v655_v42  ;;  %v657_v53 = vmul.f32 %v1445_v45, %v592_v18  ;;  %v522_v57 = vadd.f32 %v465_v46, %v266_v29 }
  0x70   : > { %v1045_v6 = vpop.eup %1044  ;;  %783 = vst [vmem:[%s1591_s14] sm:$0xff] %v751_v4  ;;  %v721_v11 = vadd.f32 %v1475_v62, %v656_v35  ;;  %v593_v44 = vmul.f32 %v1521_v9, %v916_v54  ;;  %v523_v61 = vadd.f32 %v467_v32, %v267_v2  ;;  %1052 = vlog2.f32 %v431_v49 }
  0x71   : > { %v1047_v7 = vpop.eup %1046  ;;  %784 = vst [vmem:[%s1591_s14 + $0x8] sm:$0xff] %v752_v22  ;;  %v753_v40 = vmul.f32 %v1415_v23, %v720_v15  ;;  %v722_v29 = vadd.f32 %v1479_v5, %v657_v53  ;;  %v917_v36 = vadd.f32 -0.6931472, %v522_v57  ;;  %v469_v21 = vmul.f32 0.6931472, %v1045_v6  ;;  %v1636_v53 = vld [vmem:[%s1370_s11 + $0x88] sm:$0xff] }
  0x72   : > { %v754_v24 = vmul.f32 %v1415_v23, %v721_v11  ;;  %v658_v62 = vmul.f32 %v1445_v45, %v593_v44  ;;  %v918_v28 = vadd.f32 -0.6931472, %v523_v61  ;;  %v432_v8 = vadd.f32 1.0, %v1043_v50 }
  0x73   : > { %785 = vst [vmem:[%s1591_s14 + $0x10] sm:$0xff] %v753_v40  ;;  %v755_v43 = vmul.f32 %v1415_v23, %v722_v29  ;;  %v594_v2 = vmul.f32 %v1521_v9, %v917_v36  ;;  %v524_v38 = vadd.f32 %v469_v21, %v268_v26  ;;  %v433_v58 = vadd.f32 1.0, %v1047_v7 }
  0x74   : > { %v1049_v5 = vpop.eup %1048  ;;  %786 = vst [vmem:[%s1591_s14 + $0x18] sm:$0xff] %v754_v24  ;;  %v723_v30 = vadd.f32 %v1491_v20, %v658_v62  ;;  %v595_v31 = vmul.f32 %v1521_v9, %v918_v28  ;;  %1054 = vlog2.f32 %v432_v8  ;;  %v307_v60 = vand.u32 2147483647, %v1560_v3 }
  0x75   : > { %v1051_v17 = vpop.eup %1050  ;;  %787 = vst [vmem:[%s1591_s14 + $0x20] sm:$0xff] %v755_v43  ;;  %v659_v49 = vmul.f32 %v1445_v45, %v594_v2  ;;  %v919_v37 = vadd.f32 -0.6931472, %v524_v38  ;;  %v471_v34 = vmul.f32 0.6931472, %v1049_v5  ;;  %1056 = vlog2.f32 %v433_v58 }
  0x76   : > { %v756_v26 = vmul.f32 %v1415_v23, %v723_v30  ;;  %v660_v42 = vmul.f32 %v1445_v45, %v595_v31  ;;  %v473_v20 = vmul.f32 0.6931472, %v1051_v17  ;;  %1058 = vpow2.f32 %v1567_v51 }
  0x77   : > { %v724_v18 = vadd.f32 %v1513_v55, %v659_v49  ;;  %v596_v46 = vmul.f32 %v1521_v9, %v919_v37  ;;  %v525_v4 = vadd.f32 %v471_v34, %v269_v48  ;;  %v339_v35 = vsub.f32 0.0, %v307_v60 }
  0x78   : > { %788 = vst [vmem:[%s1591_s14 + $0x28] sm:$0xff] %v756_v26  ;;  %v725_v54 = vadd.f32 %v1524_v10, %v660_v42  ;;  %v2025_v32 = vmax.f32 %v1484_v13, 0.0  ;;  %v271_v22 = vmax.f32 %v1500_v39, 0.0  ;;  %v1631_v51 = vmul.f32 %v1380_v1, %v1615_v56  ;;  %v1670_v26 = vld [vmem:[%s1370_s11 + $0x98] sm:$0xff] }
  0x79   : > { %v757_v55 = vmul.f32 %v1415_v23, %v724_v18  ;;  %v661_v59 = vmul.f32 %v1445_v45, %v596_v46  ;;  %v920_v48 = vadd.f32 -0.6931472, %v525_v4  ;;  %v386_v15 = vmul.f32 1.442695, %v339_v35 }
  0x7a   : > { %v526_v50 = vadd.f32 %v473_v20, %v2025_v32  ;;  %v1053_v57 = vpop.eup %1052  ;;  %v758_v10 = vmul.f32 %v1415_v23, %v725_v54  ;;  %v695_v13 = vmul.f32 %v1435_v41, %v1531_v14  ;;  %v696_v6 = vmul.f32 %v1435_v41, %v1546_v33 }
  0x7b   : > { %789 = vst [vmem:[%s1591_s14 + $0x30] sm:$0xff] %v757_v55  ;;  %v726_v11 = vadd.f32 %v1539_v27, %v661_v59  ;;  %v597_v44 = vmul.f32 %v1521_v9, %v920_v48  ;;  %v475_v61 = vmul.f32 0.6931472, %v1053_v57  ;;  %1060 = vpow2.f32 %v386_v15 }
  0x7c   : > { %v921_v39 = vadd.f32 -0.6931472, %v526_v50  ;;  %790 = vst [vmem:[%s1591_s14 + $0x38] sm:$0xff] %v758_v10  ;;  %v697_v40 = vmul.f32 %v1435_v41, %v1554_v16  ;;  %v308_v14 = vand.u32 2147483647, %v1631_v51  ;;  %v1653_v29 = vmul.f32 %v1380_v1, %v1636_v53 }
  0x7d   : > { %v759_v33 = vmul.f32 %v1415_v23, %v726_v11  ;;  %v662_v27 = vmul.f32 %v1445_v45, %v597_v44  ;;  %v527_v36 = vadd.f32 %v475_v61, %v271_v22  ;;  %v272_v21 = vmax.f32 %v1505_v47, 0.0  ;;  %v1696_v61 = vld [vmem:[%s1370_s11 + $0xa8] sm:$0xff] }
  0x7e   : > { %v598_v7 = vmul.f32 %v1521_v9, %v921_v39  ;;  %v1055_v24 = vpop.eup %1054  ;;  %v632_v28 = vmul.f32 0.5, %v1495_v25  ;;  %v273_v16 = vmax.f32 %v1528_v12, 0.0  ;;  %v340_v8 = vsub.f32 0.0, %v308_v14  ;;  %v1665_v25 = vld [vmem:[%s1370_s11 + $0x90] sm:$0xff] }
  0x7f   : > { %v1057_v43 = vpop.eup %1056  ;;  %791 = vst [vmem:[%s1591_s14 + $0x40] sm:$0xff] %v759_v33  ;;  %v727_v2 = vadd.f32 %v695_v13, %v662_v27  ;;  %v922_v38 = vadd.f32 -0.6931472, %v527_v36  ;;  %v477_v58 = vmul.f32 0.6931472, %v1055_v24  ;;  %v633_v60 = vmul.f32 0.5, %v1510_v52 }
  0x80   : > { %v663_v62 = vmul.f32 %v1445_v45, %v598_v7  ;;  %v309_v5 = vand.u32 2147483647, %v1653_v29  ;;  %v1059_v30 = vpop.eup %1058  ;;  %v479_v31 = vmul.f32 0.6931472, %v1057_v43  ;;  %v388_v17 = vmul.f32 1.442695, %v340_v8 }
  0x81   : > { %v760_v12 = vmul.f32 %v1415_v23, %v727_v2  ;;  %v599_v49 = vmul.f32 %v1521_v9, %v922_v38  ;;  %v528_v37 = vadd.f32 %v477_v58, %v272_v21  ;;  %v434_v34 = vadd.f32 1.0, %v1059_v30  ;;  %v1690_v13 = vld [vmem:[%s1370_s11 + $0xa0] sm:$0xff]  ;;  %v1717_v8 = vld [vmem:[%s1370_s11 + $0xb0] sm:$0xff] }
  0x82   : > { %v728_v47 = vadd.f32 %v696_v6, %v663_v62  ;;  %v529_v20 = vadd.f32 %v479_v31, %v273_v16  ;;  %1062 = vpow2.f32 %v388_v17  ;;  %v341_v18 = vsub.f32 0.0, %v309_v5 }
  0x83   : > { %792 = vst [vmem:[%s1591_s14 + $0x48] sm:$0xff] %v760_v12  ;;  %v664_v52 = vmul.f32 %v1445_v45, %v599_v49  ;;  %v923_v46 = vadd.f32 -0.6931472, %v528_v37  ;;  %1064 = vlog2.f32 %v434_v34  ;;  %v1677_v4 = vmul.f32 %v1380_v1, %v1665_v25 }
  0x84   : > { %v761_v42 = vmul.f32 %v1415_v23, %v728_v47  ;;  %v924_v35 = vadd.f32 -0.6931472, %v529_v20  ;;  %v390_v54 = vmul.f32 1.442695, %v341_v18  ;;  %v1682_v32 = vmul.f32 %v1380_v1, %v1670_v26 }
  0x85   : > { %v1061_v50 = vpop.eup %1060  ;;  %v729_v22 = vadd.f32 %v697_v40, %v664_v52  ;;  %v600_v55 = vmul.f32 %v1521_v9, %v923_v46  ;;  %v698_v59 = vmul.f32 %v1435_v41, %v632_v28  ;;  %v310_v48 = vand.u32 2147483647, %v1677_v4 }
  0x86   : > { %793 = vst [vmem:[%s1591_s14 + $0x50] sm:$0xff] %v761_v42  ;;  %v601_v15 = vmul.f32 %v1521_v9, %v924_v35  ;;  %v699_v57 = vmul.f32 %v1435_v41, %v633_v60  ;;  %v435_v10 = vadd.f32 1.0, %v1061_v50  ;;  %1066 = vpow2.f32 %v390_v54  ;;  %v1738_v42 = vld [vmem:[%s1370_s11 + $0xc0] sm:$0xff] }
  0x87   : > { %v762_v39 = vmul.f32 %v1415_v23, %v729_v22  ;;  %v665_v6 = vmul.f32 %v1445_v45, %v600_v55  ;;  %v634_v11 = vmul.f32 0.5, %v1518_v63  ;;  %v342_v44 = vsub.f32 0.0, %v310_v48 }
  0x88   : > { %v666_v7 = vmul.f32 %v1445_v45, %v601_v15  ;;  %1068 = vlog2.f32 %v435_v10  ;;  %v311_v40 = vand.u32 2147483647, %v1682_v32  ;;  %v635_v33 = vmul.f32 0.5, %v1549_v0 }
  0x89   : > { %794 = vst [vmem:[%s1591_s14 + $0x58] sm:$0xff] %v762_v39  ;;  %v730_v14 = vadd.f32 %v698_v59, %v665_v6  ;;  %v392_v27 = vmul.f32 1.442695, %v342_v44  ;;  %v1704_v36 = vmul.f32 %v1380_v1, %v1690_v13  ;;  %v274_v21 = vmax.f32 %v1535_v19, 0.0  ;;  %v1761_v44 = vld [vmem:[%s1370_s11 + $0xc8] sm:$0xff] }
  0x8a   : > { %v731_v63 = vadd.f32 %v699_v57, %v666_v7  ;;  %v343_v24 = vsub.f32 0.0, %v311_v40  ;;  %v1709_v62 = vmul.f32 %v1380_v1, %v1696_v61  ;;  %v1713_v16 = vmul.f32 %v1435_v41, %v634_v11 }
  0x8b   : > { %v763_v28 = vmul.f32 %v1415_v23, %v730_v14  ;;  %1070 = vpow2.f32 %v392_v27  ;;  %v312_v0 = vand.u32 2147483647, %v1704_v36  ;;  %v275_v2 = vmax.f32 %v1560_v3, 0.0 }
  0x8c   : > { %v1063_v43 = vpop.eup %1062  ;;  %v764_v19 = vmul.f32 %v1415_v23, %v731_v63  ;;  %v636_v38 = vmul.f32 0.5, %v1615_v56  ;;  %v394_v58 = vmul.f32 1.442695, %v343_v24  ;;  %v1724_v30 = vmul.f32 %v1435_v41, %v635_v33  ;;  %v1734_v56 = vld [vmem:[%s1370_s11 + $0xb8] sm:$0xff] }
  0x8d   : > { %v1065_v5 = vpop.eup %1064  ;;  %795 = vst [vmem:[%s1591_s14 + $0x60] sm:$0xff] %v763_v28  ;;  %v436_v47 = vadd.f32 1.0, %v1063_v43  ;;  %v344_v31 = vsub.f32 0.0, %v312_v0  ;;  %v313_v60 = vand.u32 2147483647, %v1709_v62  ;;  %v276_v12 = vmax.f32 %v1631_v51, 0.0 }
  0x8e   : > { %796 = vst [vmem:[%s1591_s14 + $0x68] sm:$0xff] %v764_v19  ;;  %v481_v17 = vmul.f32 0.6931472, %v1065_v5  ;;  %1072 = vpow2.f32 %v394_v58  ;;  %v1731_v3 = vmul.f32 %v1380_v1, %v1717_v8  ;;  %v637_v49 = vmul.f32 0.5, %v1636_v53 }
  0x8f   : > { %1074 = vlog2.f32 %v436_v47  ;;  %v396_v37 = vmul.f32 1.442695, %v344_v31  ;;  %v345_v34 = vsub.f32 0.0, %v313_v60  ;;  %v1741_v52 = vmul.f32 %v1435_v41, %v636_v38  ;;  %v1777_v47 = vld [vmem:[%s1370_s11 + $0xd0] sm:$0xff] }
  0x90   : > { %v1067_v20 = vpop.eup %1066  ;;  %v530_v18 = vadd.f32 %v481_v17, %v274_v21  ;;  %v638_v46 = vmul.f32 0.5, %v1665_v25  ;;  %v314_v35 = vand.u32 2147483647, %v1731_v3  ;;  %v1747_v53 = vmul.f32 %v1380_v1, %v1734_v56 }
  0x91   : > { %v437_v54 = vadd.f32 1.0, %v1067_v20  ;;  %1076 = vpow2.f32 %v396_v37  ;;  %v398_v50 = vmul.f32 1.442695, %v345_v34  ;;  %v277_v59 = vmax.f32 %v1653_v29, 0.0 }
  0x92   : > { %v1069_v22 = vpop.eup %1068  ;;  %v925_v55 = vadd.f32 -0.6931472, %v530_v18  ;;  %v346_v48 = vsub.f32 0.0, %v314_v35  ;;  %v1752_v15 = vmul.f32 %v1380_v1, %v1738_v42  ;;  %v1755_v57 = vmul.f32 %v1435_v41, %v637_v49 }
  0x93   : > { %v483_v25 = vmul.f32 0.6931472, %v1069_v22  ;;  %1078 = vlog2.f32 %v437_v54  ;;  %v315_v10 = vand.u32 2147483647, %v1747_v53  ;;  %v278_v6 = vmax.f32 %v1677_v4, 0.0 }
  0x94   : > { %v602_v39 = vmul.f32 %v1521_v9, %v925_v55  ;;  %1080 = vpow2.f32 %v398_v50  ;;  %v400_v11 = vmul.f32 1.442695, %v346_v48  ;;  %v1764_v14 = vmul.f32 %v1435_v41, %v638_v46 }
  0x95   : > { %v1071_v7 = vpop.eup %1070  ;;  %v531_v40 = vadd.f32 %v483_v25, %v275_v2  ;;  %v347_v33 = vsub.f32 0.0, %v315_v10  ;;  %v316_v27 = vand.u32 2147483647, %v1752_v15  ;;  %v639_v24 = vmul.f32 0.5, %v1670_v26 }
  0x96   : > { %v667_v63 = vmul.f32 %v1445_v45, %v602_v39  ;;  %v438_v21 = vadd.f32 1.0, %v1071_v7  ;;  %1082 = vpow2.f32 %v400_v11  ;;  %v1771_v19 = vmul.f32 %v1380_v1, %v1761_v44  ;;  %v1801_v39 = vld [vmem:[%s1370_s11 + $0xd8] sm:$0xff] }
  0x97   : > { %v926_v28 = vadd.f32 -0.6931472, %v531_v40  ;;  %v402_v0 = vmul.f32 1.442695, %v347_v33  ;;  %v348_v43 = vsub.f32 0.0, %v316_v27  ;;  %v279_v58 = vmax.f32 %v1682_v32, 0.0 }
  0x98   : > { %v1073_v2 = vpop.eup %1072  ;;  %v732_v38 = vadd.f32 %v1713_v16, %v667_v63  ;;  %1084 = vlog2.f32 %v438_v21  ;;  %v640_v5 = vmul.f32 0.5, %v1690_v13  ;;  %v1782_v34 = vmul.f32 %v1435_v41, %v639_v24 }
  0x99   : > { %v1075_v26 = vpop.eup %1074  ;;  %v603_v31 = vmul.f32 %v1521_v9, %v926_v28  ;;  %v439_v60 = vadd.f32 1.0, %v1073_v2  ;;  %1086 = vpow2.f32 %v402_v0  ;;  %v404_v17 = vmul.f32 1.442695, %v348_v43  ;;  %v1813_v28 = vld [vmem:[%s1370_s11 + $0xe0] sm:$0xff] }
  0x9a   : > { %v765_v49 = vmul.f32 %v1415_v23, %v732_v38  ;;  %v485_v37 = vmul.f32 0.6931472, %v1075_v26  ;;  %v317_v16 = vand.u32 2147483647, %v1771_v19  ;;  %v280_v18 = vmax.f32 %v1704_v36, 0.0 }
  0x9b   : > { %v1077_v20 = vpop.eup %1076  ;;  %v668_v13 = vmul.f32 %v1445_v45, %v603_v31  ;;  %1088 = vlog2.f32 %v439_v60  ;;  %v1789_v46 = vmul.f32 %v1380_v1, %v1777_v47  ;;  %v1796_v48 = vmul.f32 %v1435_v41, %v640_v5 }
  0x9c   : > { %797 = vst [vmem:[%s1591_s14 + $0x70] sm:$0xff] %v765_v49  ;;  %v532_v35 = vadd.f32 %v485_v37, %v276_v12  ;;  %v440_v54 = vadd.f32 1.0, %v1077_v20  ;;  %1090 = vpow2.f32 %v404_v17  ;;  %v349_v50 = vsub.f32 0.0, %v317_v16 }
  0x9d   : > { %v1079_v22 = vpop.eup %1078  ;;  %v733_v55 = vadd.f32 %v1724_v30, %v668_v13  ;;  %v641_v25 = vmul.f32 0.5, %v1696_v61  ;;  %v318_v10 = vand.u32 2147483647, %v1789_v46  ;;  %v281_v30 = vmax.f32 %v1709_v62, 0.0 }
  0x9e   : > { %v1081_v11 = vpop.eup %1080  ;;  %v927_v51 = vadd.f32 -0.6931472, %v532_v35  ;;  %v487_v12 = vmul.f32 0.6931472, %v1079_v22  ;;  %1092 = vlog2.f32 %v440_v54  ;;  %v406_v7 = vmul.f32 1.442695, %v349_v50 }
  0x9f   : > { %v766_v40 = vmul.f32 %v1415_v23, %v733_v55  ;;  %v441_v33 = vadd.f32 1.0, %v1081_v11  ;;  %v350_v27 = vsub.f32 0.0, %v318_v10  ;;  %v1810_v24 = vmul.f32 %v1380_v1, %v1801_v39  ;;  %v1836_v22 = vld [vmem:[%s1370_s11 + $0xe8] sm:$0xff] }
  0xa0   : > { %v1083_v63 = vpop.eup %1082  ;;  %v604_v61 = vmul.f32 %v1521_v9, %v927_v51  ;;  %v533_v21 = vadd.f32 %v487_v12, %v277_v59  ;;  %1094 = vpow2.f32 %v406_v7  ;;  %v642_v43 = vmul.f32 0.5, %v1717_v8 }
  0xa1   : > { %798 = vst [vmem:[%s1591_s14 + $0x78] sm:$0xff] %v766_v40  ;;  %1096 = vlog2.f32 %v441_v33  ;;  %v442_v0 = vadd.f32 1.0, %v1083_v63  ;;  %v408_v2 = vmul.f32 1.442695, %v350_v27  ;;  %v1819_v29 = vmul.f32 %v1435_v41, %v641_v25 }
  0xa2   : > { %v1085_v38 = vpop.eup %1084  ;;  %v669_v5 = vmul.f32 %v1445_v45, %v604_v61  ;;  %v928_v26 = vadd.f32 -0.6931472, %v533_v21  ;;  %v319_v59 = vand.u32 2147483647, %v1810_v24  ;;  %v282_v17 = vmax.f32 %v1731_v3, 0.0 }
  0xa3   : > { %v1087_v31 = vpop.eup %1086  ;;  %v489_v60 = vmul.f32 0.6931472, %v1085_v38  ;;  %1098 = vlog2.f32 %v442_v0  ;;  %v1825_v49 = vmul.f32 %v1380_v1, %v1813_v28  ;;  %v1832_v35 = vmul.f32 %v1435_v41, %v642_v43 }
  0xa4   : > { %v734_v8 = vadd.f32 %v1741_v52, %v669_v5  ;;  %v605_v37 = vmul.f32 %v1521_v9, %v928_v26  ;;  %v443_v16 = vadd.f32 1.0, %v1087_v31  ;;  %1100 = vpow2.f32 %v408_v2 }
  0xa5   : > { %v1089_v20 = vpop.eup %1088  ;;  %v534_v13 = vadd.f32 %v489_v60, %v278_v6  ;;  %v351_v54 = vsub.f32 0.0, %v319_v59  ;;  %v320_v50 = vand.u32 2147483647, %v1825_v49  ;;  %v643_v33 = vmul.f32 0.5, %v1734_v56 }
  0xa6   : > { %v1091_v55 = vpop.eup %1090  ;;  %v767_v52 = vmul.f32 %v1415_v23, %v734_v8  ;;  %v670_v25 = vmul.f32 %v1445_v45, %v605_v37  ;;  %v491_v10 = vmul.f32 0.6931472, %v1089_v20  ;;  %1102 = vlog2.f32 %v443_v16 }
  0xa7   : > { %v929_v11 = vadd.f32 -0.6931472, %v534_v13  ;;  %v444_v51 = vadd.f32 1.0, %v1091_v55  ;;  %v410_v4 = vmul.f32 1.442695, %v351_v54  ;;  %v352_v12 = vsub.f32 0.0, %v320_v50 }
  0xa8   : > { %v1093_v6 = vpop.eup %1092  ;;  %799 = vst [vmem:[%s1591_s14 + $0x80] sm:$0xff] %v767_v52  ;;  %v735_v7 = vadd.f32 %v1755_v57, %v670_v25  ;;  %v535_v40 = vadd.f32 %v491_v10, %v279_v58  ;;  %v1847_v27 = vmul.f32 %v1380_v1, %v1836_v22  ;;  %v283_v57 = vmax.f32 %v1747_v53, 0.0  ;;  %v1867_v54 = vld [vmem:[%s1370_s11 + $0xf0] sm:$0xff] }
  0xa9   : > { %v606_v63 = vmul.f32 %v1521_v9, %v929_v11  ;;  %v493_v61 = vmul.f32 0.6931472, %v1093_v6  ;;  %1104 = vlog2.f32 %v444_v51  ;;  %v412_v21 = vmul.f32 1.442695, %v352_v12 }
  0xaa   : > { %v1095_v0 = vpop.eup %1094  ;;  %v768_v43 = vmul.f32 %v1415_v23, %v735_v7  ;;  %v930_v2 = vadd.f32 -0.6931472, %v535_v40  ;;  %1106 = vpow2.f32 %v410_v4  ;;  %v1858_v59 = vmul.f32 %v1435_v41, %v643_v33 }
  0xab   : > { %v1097_v32 = vpop.eup %1096  ;;  %v671_v56 = vmul.f32 %v1445_v45, %v606_v63  ;;  %v536_v58 = vadd.f32 %v493_v61, %v280_v18  ;;  %v445_v38 = vadd.f32 1.0, %v1095_v0  ;;  %1108 = vpow2.f32 %v412_v21 }
  0xac   : > { %800 = vst [vmem:[%s1591_s14 + $0x88] sm:$0xff] %v768_v43  ;;  %v607_v5 = vmul.f32 %v1521_v9, %v930_v2  ;;  %v495_v26 = vmul.f32 0.6931472, %v1097_v32  ;;  %v321_v31 = vand.u32 2147483647, %v1847_v27  ;;  %v284_v37 = vmax.f32 %v1752_v15, 0.0 }
  0xad   : > { %v1099_v53 = vpop.eup %1098  ;;  %v736_v60 = vadd.f32 %v1764_v14, %v671_v56  ;;  %v931_v8 = vadd.f32 -0.6931472, %v536_v58  ;;  %1110 = vlog2.f32 %v445_v38  ;;  %v644_v14 = vmul.f32 0.5, %v1738_v42 }
  0xae   : > { %v1101_v36 = vpop.eup %1100  ;;  %v672_v18 = vmul.f32 %v1445_v45, %v607_v5  ;;  %v537_v16 = vadd.f32 %v495_v26, %v281_v30  ;;  %v497_v20 = vmul.f32 0.6931472, %v1099_v53  ;;  %v353_v13 = vsub.f32 0.0, %v321_v31  ;;  %v1894_v26 = vld [vmem:[%s1370_s11 + $0xf8] sm:$0xff] }
  0xaf   : > { %v769_v50 = vmul.f32 %v1415_v23, %v736_v60  ;;  %v608_v55 = vmul.f32 %v1521_v9, %v931_v8  ;;  %v446_v52 = vadd.f32 1.0, %v1101_v36  ;;  %v1879_v4 = vmul.f32 %v1380_v1, %v1867_v54 }
  0xb0   : > { %v1103_v15 = vpop.eup %1102  ;;  %v737_v25 = vadd.f32 %v1782_v34, %v672_v18  ;;  %v932_v10 = vadd.f32 -0.6931472, %v537_v16  ;;  %v538_v11 = vadd.f32 %v497_v20, %v282_v17  ;;  %v414_v62 = vmul.f32 1.442695, %v353_v13 }
  0xb1   : > { %801 = vst [vmem:[%s1591_s14 + $0x90] sm:$0xff] %v769_v50  ;;  %v673_v30 = vmul.f32 %v1445_v45, %v608_v55  ;;  %v499_v51 = vmul.f32 0.6931472, %v1103_v15  ;;  %1112 = vlog2.f32 %v446_v52  ;;  %v710_v7 = vmul.f32 %v1435_v41, %v644_v14 }
  0xb2   : > { %v770_v42 = vmul.f32 %v1415_v23, %v737_v25  ;;  %v609_v12 = vmul.f32 %v1521_v9, %v932_v10  ;;  %v933_v34 = vadd.f32 -0.6931472, %v538_v11  ;;  %1114 = vpow2.f32 %v414_v62 }
  0xb3   : > { %v1105_v6 = vpop.eup %1104  ;;  %v738_v3 = vadd.f32 %v1796_v48, %v673_v30  ;;  %v539_v17 = vadd.f32 %v499_v51, %v283_v57  ;;  %v322_v40 = vand.u32 2147483647, %v1879_v4  ;;  %v285_v0 = vmax.f32 %v1771_v19, 0.0 }
  0xb4   : > { %v1107_v33 = vpop.eup %1106  ;;  %802 = vst [vmem:[%s1591_s14 + $0x98] sm:$0xff] %v770_v42  ;;  %v674_v63 = vmul.f32 %v1445_v45, %v609_v12  ;;  %v610_v61 = vmul.f32 %v1521_v9, %v933_v34  ;;  %v501_v21 = vmul.f32 0.6931472, %v1105_v6  ;;  %v645_v19 = vmul.f32 0.5, %v1761_v44 }
  0xb5   : > { %v1109_v43 = vpop.eup %1108  ;;  %v771_v2 = vmul.f32 %v1415_v23, %v738_v3  ;;  %v934_v48 = vadd.f32 -0.6931472, %v539_v17  ;;  %v447_v57 = vadd.f32 1.0, %v1107_v33  ;;  %v354_v32 = vsub.f32 0.0, %v322_v40 }
  0xb6   : > { %v739_v56 = vadd.f32 %v1819_v29, %v674_v63  ;;  %v675_v58 = vmul.f32 %v1445_v45, %v610_v61  ;;  %v540_v38 = vadd.f32 %v501_v21, %v284_v37  ;;  %v448_v5 = vadd.f32 1.0, %v1109_v43 }
  0xb7   : > { %v1111_v31 = vpop.eup %1110  ;;  %803 = vst [vmem:[%s1591_s14 + $0xa0] sm:$0xff] %v771_v2  ;;  %v611_v53 = vmul.f32 %v1521_v9, %v934_v48  ;;  %1116 = vlog2.f32 %v447_v57  ;;  %v416_v60 = vmul.f32 1.442695, %v354_v32  ;;  %v286_v16 = vmax.f32 %v1789_v46, 0.0 }
  0xb8   : > { %v772_v8 = vmul.f32 %v1415_v23, %v739_v56  ;;  %v740_v36 = vadd.f32 %v1832_v35, %v675_v58  ;;  %v935_v29 = vadd.f32 -0.6931472, %v540_v38  ;;  %v503_v18 = vmul.f32 0.6931472, %v1111_v31 }
  0xb9   : > { %v676_v37 = vmul.f32 %v1445_v45, %v611_v53  ;;  %1118 = vlog2.f32 %v448_v5  ;;  %v1905_v20 = vmul.f32 %v1380_v1, %v1894_v26  ;;  %v646_v10 = vmul.f32 0.5, %v1777_v47 }
  0xba   : > { %804 = vst [vmem:[%s1591_s14 + $0xa8] sm:$0xff] %v772_v8  ;;  %v773_v44 = vmul.f32 %v1415_v23, %v740_v36  ;;  %v612_v13 = vmul.f32 %v1521_v9, %v935_v29  ;;  %v541_v50 = vadd.f32 %v503_v18, %v285_v0  ;;  %1120 = vpow2.f32 %v416_v60 }
  0xbb   : > { %v1113_v35 = vpop.eup %1112  ;;  %v741_v55 = vadd.f32 %v1858_v59, %v676_v37  ;;  %v323_v14 = vand.u32 2147483647, %v1905_v20  ;;  %v711_v59 = vmul.f32 %v1435_v41, %v645_v19  ;;  %v287_v17 = vmax.f32 %v1810_v24, 0.0 }
  0xbc   : > { %v1115_v52 = vpop.eup %1114  ;;  %805 = vst [vmem:[%s1591_s14 + $0xb0] sm:$0xff] %v773_v44  ;;  %v677_v46 = vmul.f32 %v1445_v45, %v612_v13  ;;  %v936_v15 = vadd.f32 -0.6931472, %v541_v50  ;;  %v505_v1 = vmul.f32 0.6931472, %v1113_v35  ;;  %v712_v40 = vmul.f32 %v1435_v41, %v646_v10 }
  0xbd   : > { %v774_v25 = vmul.f32 %v1415_v23, %v741_v55  ;;  %v449_v11 = vadd.f32 1.0, %v1115_v52  ;;  %v355_v62 = vsub.f32 0.0, %v323_v14  ;;  %v288_v61 = vmax.f32 %v1825_v49, 0.0 }
  0xbe   : > { %v742_v30 = vadd.f32 %v710_v7, %v677_v46  ;;  %v613_v51 = vmul.f32 %v1521_v9, %v936_v15  ;;  %v542_v42 = vadd.f32 %v505_v1, %v286_v16  ;;  %v647_v0 = vmul.f32 0.5, %v1801_v39 }
  0xbf   : > { %806 = vst [vmem:[%s1591_s14 + $0xb8] sm:$0xff] %v774_v25  ;;  %1122 = vlog2.f32 %v449_v11  ;;  %v418_v12 = vmul.f32 1.442695, %v355_v62  ;;  %v648_v5 = vmul.f32 0.5, %v1813_v28  ;;  %v289_v19 = vmax.f32 %v1847_v27, 0.0 }
  0xc0   : > { %v775_v34 = vmul.f32 %v1415_v23, %v742_v30  ;;  %v678_v6 = vmul.f32 %v1445_v45, %v613_v51  ;;  %v937_v3 = vadd.f32 -0.6931472, %v542_v42  ;;  %v713_v49 = vmul.f32 %v1435_v41, %v647_v0 }
  0xc1   : > { %v1117_v47 = vpop.eup %1116  ;;  %1124 = vpow2.f32 %v418_v12  ;;  %v714_v29 = vmul.f32 %v1435_v41, %v648_v5  ;;  %v649_v37 = vmul.f32 0.5, %v1836_v22  ;;  %v290_v22 = vmax.f32 %v1879_v4, 0.0 }
  0xc2   : > { %807 = vst [vmem:[%s1591_s14 + $0xc0] sm:$0xff] %v775_v34  ;;  %v743_v7 = vadd.f32 %v711_v59, %v678_v6  ;;  %v614_v33 = vmul.f32 %v1521_v9, %v937_v3  ;;  %v507_v63 = vmul.f32 0.6931472, %v1117_v47  ;;  %v650_v62 = vmul.f32 0.5, %v1867_v54 }
  0xc3   : > { %v1119_v21 = vpop.eup %1118  ;;  %v715_v46 = vmul.f32 %v1435_v41, %v649_v37  ;;  %v291_v59 = vmax.f32 %v1905_v20, 0.0  ;;  %v651_v54 = vmul.f32 0.5, %v1894_v26 }
  0xc4   : > { %v1121_v43 = vpop.eup %1120  ;;  %v776_v2 = vmul.f32 %v1415_v23, %v743_v7  ;;  %v679_v24 = vmul.f32 %v1445_v45, %v614_v33  ;;  %v543_v48 = vadd.f32 %v507_v63, %v287_v17  ;;  %v509_v57 = vmul.f32 0.6931472, %v1119_v21 }
  0xc5   : > { %v450_v32 = vadd.f32 1.0, %v1121_v43  ;;  %v716_v12 = vmul.f32 %v1435_v41, %v650_v62  ;;  %v717_v7 = vmul.f32 %v1435_v41, %v651_v54 }
  0xc6   : > { %808 = vst [vmem:[%s1591_s14 + $0xc8] sm:$0xff] %v776_v2  ;;  %v744_v56 = vadd.f32 %v712_v40, %v679_v24  ;;  %v938_v58 = vadd.f32 -0.6931472, %v543_v48  ;;  %v544_v38 = vadd.f32 %v509_v57, %v288_v61 }
  0xc7   : > { %1126 = vlog2.f32 %v450_v32 }
  0xc8   : > { %v777_v39 = vmul.f32 %v1415_v23, %v744_v56  ;;  %v615_v31 = vmul.f32 %v1521_v9, %v938_v58  ;;  %v939_v53 = vadd.f32 -0.6931472, %v544_v38 }
  0xc9   : > { %v1123_v60 = vpop.eup %1122 }
  0xca   : > { %809 = vst [vmem:[%s1591_s14 + $0xd0] sm:$0xff] %v777_v39  ;;  %v680_v8 = vmul.f32 %v1445_v45, %v615_v31  ;;  %v616_v36 = vmul.f32 %v1521_v9, %v939_v53  ;;  %v511_v28 = vmul.f32 0.6931472, %v1123_v60 }
  0xcb   : > { %v1125_v18 = vpop.eup %1124 }
  0xcc   : > { %v745_v16 = vadd.f32 %v713_v49, %v680_v8  ;;  %v681_v44 = vmul.f32 %v1445_v45, %v616_v36  ;;  %v545_v13 = vadd.f32 %v511_v28, %v289_v19  ;;  %v451_v50 = vadd.f32 1.0, %v1125_v18 }
  0xce   : > { %v778_v27 = vmul.f32 %v1415_v23, %v745_v16  ;;  %v746_v35 = vadd.f32 %v714_v29, %v681_v44  ;;  %v940_v55 = vadd.f32 -0.6931472, %v545_v13  ;;  %1128 = vlog2.f32 %v451_v50 }
  0xd0   : > { %810 = vst [vmem:[%s1591_s14 + $0xd8] sm:$0xff] %v778_v27  ;;  %v779_v14 = vmul.f32 %v1415_v23, %v746_v35  ;;  %v617_v52 = vmul.f32 %v1521_v9, %v940_v55 }
  0xd1   : > { %v1127_v15 = vpop.eup %1126 }
  0xd2   : > { %811 = vst [vmem:[%s1591_s14 + $0xe0] sm:$0xff] %v779_v14  ;;  %v682_v1 = vmul.f32 %v1445_v45, %v617_v52  ;;  %v513_v25 = vmul.f32 0.6931472, %v1127_v15 }
  0xd4   : > { %v747_v10 = vadd.f32 %v715_v46, %v682_v1  ;;  %v546_v11 = vadd.f32 %v513_v25, %v290_v22 }
  0xd6   : > { %v780_v30 = vmul.f32 %v1415_v23, %v747_v10  ;;  %v941_v51 = vadd.f32 -0.6931472, %v546_v11 }
  0xd8   : > { %v1129_v42 = vpop.eup %1128  ;;  %812 = vst [vmem:[%s1591_s14 + $0xe8] sm:$0xff] %v780_v30  ;;  %v618_v4 = vmul.f32 %v1521_v9, %v941_v51 }
  0xd9   : > { %v515_v34 = vmul.f32 0.6931472, %v1129_v42 }
  0xda   : > { %v683_v6 = vmul.f32 %v1445_v45, %v618_v4 }
  0xdb   : > { %v547_v3 = vadd.f32 %v515_v34, %v291_v59 }
  0xdc   : > { %v748_v17 = vadd.f32 %v716_v12, %v683_v6 }
  0xdd   : > { %v942_v47 = vadd.f32 -0.6931472, %v547_v3 }
  0xde   : > { %v781_v20 = vmul.f32 %v1415_v23, %v748_v17 }
  0xdf   : > { %v619_v40 = vmul.f32 %v1521_v9, %v942_v47 }
  0xe0   : > { %813 = vst [vmem:[%s1591_s14 + $0xf0] sm:$0xff] %v781_v20 }
  0xe1   : > { %v684_v33 = vmul.f32 %v1445_v45, %v619_v40 }
  0xe3   : > { %v749_v63 = vadd.f32 %v717_v7, %v684_v33 }
  0xe5   : > { %v782_v26 = vmul.f32 %v1415_v23, %v749_v63 }
  0xe7   : > { %814 = vst [vmem:[%s1591_s14 + $0xf8] sm:$0xff] %v782_v26 }
  0xe8   : > { %1173 = shalt.err (!%p1170_p4)
}
  0xe9   : > { %s1174_s7 = scalar_lea.hbm %s1967_s24, 4096  ;;  %s1178_s8 = scalar_lea.hbm %s2018_s3, 8192 }
  0xea   : > { %p1175_p5 = scmp.ne.s32.totalorder %s1967_s24, %s1174_s7  ;;  %p1179_p1 = scmp.lt.u32.totalorder %s1967_s24, %s2018_s3 }
  0xeb   : > { %p1180_p3 = scmp.lt.u32.totalorder %s1178_s8, %s1174_s7  ;;  %p1182_p6 = scmp.lt.u32.totalorder %s1174_s7, %s1967_s24 }
  0xec   : > { %p1176_p7 = pnand %p1175_p5, %p2026_p12 }
  0xed   : > { %p1181_p11 = por %p1180_p3, %p1179_p1 }
  0xee   : > { %p1177_p9 = pneg %p1176_p7 }
  0xef   : > { %p1183_p13 = por %p1182_p6, %p1181_p11 }
  0xf1   : > { %p1184_p8 = pnand %p1183_p13, %p1177_p9 }
  0xf3   : > { %1187 = shalt.err (!%p1184_p8)
}
  0xf4   : > { %s1232_s10 = smov 128   ;;  %s1233_s12 = smov 8  }
  0xf5   : > { %952 = dma.vmem_to_hbm [thread:$0]  (%p2026_p12), %s1970_s1, 4096, %s1967_s24, %s816_s28, %s1232_s10, %s1232_s10, %s1233_s12  }
  0xf6 PF: > { %s844_s13 = sand.u32 1, %s1214_s16   ;;  %p2027_p10 = scmp.ne.s32.totalorder %s2023_s27, 0 }
  0xf7   : > { %p2028_p0 = scmp.ge.s32.totalorder %s1226_s19, 2  ;;  %s845_s14 = scalar_lea.sflag [#allocation6], %s844_s13 }
  0xf9   : > { %p959_p2 = pnand %p2028_p0, %p2027_p10 }
  0xfb   : > { %1209 = dma.done.wait (!%p959_p2), %s845_s14, 4096  }
  0xfc   : > { %1211 = vsyncadd (!%p959_p2), %s845_s14, 4294963200  ;;  %p18_p4 = scmp.ge.s32.totalorder %s1285_s20, 4   ;;  %s2029_s16 = smov %s1218_s17 }
  0xfd   : > { %s2030_s17 = smov %s1222_s18  ;;  %s2031_s18 = smov %s1297_s23 }
  0xfe   : > { %s2032_s19 = smov %s1285_s20  ;;  %20 = sbr.rel (!%p18_p4) target bundleno = 8 (0x8), region = 77 }
 0x105   :  { %850 = vsyncpa [#allocation5], 1 }
 0x106   :  { %852 = vsyncpa [#allocation5 + $0x1], 1 }
 0x107   :  { %853 = vsyncpa [#allocation6], 1 }
 0x108   :  { %855 = vsyncpa [#allocation6 + $0x1], 1 }

</bundles_post_ra>
